<compile_context>
chip_gen: v7x
topology: tpu7x:2x2x1
jax: 0.10.0
libtpu: 0.0.40
codegen_flags: <defaults>
</compile_context>

<pallas_src>
import numpy as np

import jax
import jax.numpy as jnp
from jax import lax
from jax.experimental import pallas as pl
from jax.experimental.pallas import tpu as pltpu


# ----------------------------- NGP.__init__ config -----------------------------
SCALE = 0.5                      # NGP(scale=0.5, ...)
STAGE_NUM = 3
L = 16                           # hash levels
F = 2                            # features per level
LOG2_T = 19
T = 1 << LOG2_T                  # hash table size per level
N_MIN = 16
B = float(np.exp(np.log(2048 * SCALE / N_MIN) / (L - 1)))
FEAT_DIM = L * F                 # 32
SH_DIM = 16                      # SphericalHarmonics degree 4
HIDDEN = 64
SIGMA_OUT = 16
OUT_W = 4                        # packed output rows: [sigma, r, g, b]
MAX_TN = 2048                    # max row tile per grid step

XYZ_MIN = -SCALE
XYZ_MAX = SCALE

RES_LIST = [int(np.floor(N_MIN * (B ** l))) for l in range(L)]


def _choose_tn(n):
    """Row tile: as large as possible (<= MAX_TN) while keeping >= 2 grid steps
    when N allows it (megacore), floored at 128.  For tiny N use the full extent."""
    if n <= 128:
        return n
    tn = MAX_TN
    while tn > 128 and tn * 2 > n:
        tn //= 2
    return tn


# --------------------------------- Pallas kernel --------------------------------
def _ngp_head_kernel(feat_ref, d_ref, ws1_ref, ws2_ref, wr1sh_ref, wr1h_ref,
                     wr2_ref, wr3_ref, out_ref):
    bf16 = jnp.bfloat16
    f32 = jnp.float32

    feat_t = feat_ref[...]                                          # (32, TN) bf16

    # ---- sigma_net (transposed): 32 -> 64 (ReLU) -> 16 ----
    h = jnp.dot(ws1_ref[...], feat_t, preferred_element_type=f32)   # (64, TN) f32
    h = jnp.maximum(h, 0.0).astype(bf16)
    h16 = jnp.dot(ws2_ref[...], h, preferred_element_type=f32)      # (16, TN) f32

    # TruncExp forward = exp (EUP), lane-dense (1, TN)
    sigma = jnp.exp(h16[0:1, :])                                     # (1, TN)

    # ---- direction normalization + SH degree-4 encoding (tcnn constants) ----
    # Component rows are (1, TN): lane-dense elementwise math, assembled in vregs.
    d = d_ref[...].astype(f32)                                       # (3, TN)
    x = d[0:1, :]
    y = d[1:2, :]
    z = d[2:3, :]
    inv = lax.rsqrt(x * x + y * y + z * z)
    x = x * inv
    y = y * inv
    z = z * inv
    xy, xz, yz = x * y, x * z, y * z
    x2, y2, z2 = x * x, y * y, z * z

    sh = jnp.concatenate([
        jnp.full_like(x, 0.28209479177387814),
        -0.48860251190291987 * y,
        0.48860251190291987 * z,
        -0.48860251190291987 * x,
        1.0925484305920792 * xy,
        -1.0925484305920792 * yz,
        0.94617469575755997 * z2 - 0.31539156525251999,
        -1.0925484305920792 * xz,
        0.54627421529603959 * (x2 - y2),
        0.59004358992664352 * y * (-3.0 * x2 + y2),
        2.8906114426405538 * xy * z,
        0.45704579946446572 * y * (1.0 - 5.0 * z2),
        0.3731763325901154 * z * (5.0 * z2 - 3.0),
        0.45704579946446572 * x * (1.0 - 5.0 * z2),
        1.4453057213202769 * z * (x2 - y2),
        0.59004358992664352 * x * (-x2 + 3.0 * y2),
    ], axis=0)                                                       # (16, TN) f32

    # ---- rgb_net (transposed): [sh | h] (32) -> 64 (ReLU) -> 64 (ReLU) -> 3 ----
    # First layer split across the two halves so no concat slab is needed.
    r = (jnp.dot(wr1sh_ref[...], sh.astype(bf16), preferred_element_type=f32)
         + jnp.dot(wr1h_ref[...], h16.astype(bf16), preferred_element_type=f32))
    r = jnp.maximum(r, 0.0).astype(bf16)                             # (64, TN)
    r = jnp.maximum(jnp.dot(wr2_ref[...], r, preferred_element_type=f32), 0.0)
    logits = jnp.dot(wr3_ref[...], r.astype(bf16),
                     preferred_element_type=f32)                     # (3, TN)
    rgb = 1.0 / (1.0 + jnp.exp(-logits))

    # single lane-dense output slab: rows = [sigma, r, g, b]
    out_ref[...] = jnp.concatenate([sigma, rgb], axis=0)             # (4, TN)


def ngp_head_pallas(feat, d, ws1, ws2, wr1, wr2, wr3):
    """feat: [N,32] hash features; d: [N,3] raw ray directions.
    Returns (sigma [N], rgb [N,3])."""
    N = feat.shape[0]
    TN = _choose_tn(N)
    grid_steps = pl.cdiv(N, TN)

    bf16 = jnp.bfloat16
    # Transposed, feature-major operands (transpose + cast fuse under the jit).
    feat_t = feat.T.astype(bf16)                 # (32, N)
    d_t = d.T.astype(jnp.float32)                # (3, N)
    ws1_t = ws1.T.astype(bf16)                   # (64, 32)
    ws2_t = ws2.T.astype(bf16)                   # (16, 64)
    wr1sh_t = wr1[:SH_DIM].T.astype(bf16)        # (64, 16)
    wr1h_t = wr1[SH_DIM:].T.astype(bf16)         # (64, 16)
    wr2_t = wr2.T.astype(bf16)                   # (64, 64)
    wr3_t = wr3.T.astype(bf16)                   # (3, 64)

    col_map = lambda i: (0, i)
    full_map = lambda i: (0, 0)

    flops = 2 * N * (FEAT_DIM * HIDDEN + HIDDEN * SIGMA_OUT
                     + SH_DIM * HIDDEN + SIGMA_OUT * HIDDEN
                     + HIDDEN * HIDDEN + HIDDEN * 3)
    bytes_accessed = (N * (FEAT_DIM * 2 + 3 * 4 + OUT_W * 4)
                      + 2 * (FEAT_DIM * HIDDEN + HIDDEN * SIGMA_OUT
                             + 2 * SH_DIM * HIDDEN + HIDDEN * HIDDEN + HIDDEN * 3))

    out = pl.pallas_call(
        _ngp_head_kernel,
        out_shape=jax.ShapeDtypeStruct((OUT_W, N), jnp.float32),
        grid=(grid_steps,),
        in_specs=[
            pl.BlockSpec((FEAT_DIM, TN), col_map),
            pl.BlockSpec((3, TN), col_map),
            pl.BlockSpec((HIDDEN, FEAT_DIM), full_map),
            pl.BlockSpec((SIGMA_OUT, HIDDEN), full_map),
            pl.BlockSpec((HIDDEN, SH_DIM), full_map),
            pl.BlockSpec((HIDDEN, SIGMA_OUT), full_map),
            pl.BlockSpec((HIDDEN, HIDDEN), full_map),
            pl.BlockSpec((3, HIDDEN), full_map),
        ],
        out_specs=pl.BlockSpec((OUT_W, TN), col_map),
        compiler_params=pltpu.CompilerParams(
            dimension_semantics=("parallel",)),
        cost_estimate=pl.CostEstimate(
            flops=flops, transcendentals=6 * N, bytes_accessed=bytes_accessed),
    )(feat_t, d_t, ws1_t, ws2_t, wr1sh_t, wr1h_t, wr2_t, wr3_t)

    return out[0], out[1:4].T


# ------------------------- hash-grid encoding (JAX glue) ------------------------
def hash_grid_encode(x01, table):
    """Multiresolution hash-grid encoding with trilinear interpolation.

    x01:   [N,3] in [0,1]
    table: [L, T, F] hash-table features
    returns [N, L*F] f32 (transpose + bf16 cast fuse into this under jit)
    """
    primes = jnp.array([1, 2654435761, 805459861], dtype=jnp.uint32)
    outs = []
    for lvl, res in enumerate(RES_LIST):
        pos = x01 * (res - 1)
        p0 = jnp.floor(pos)
        frac = pos - p0
        p0 = p0.astype(jnp.uint32)
        acc = jnp.zeros((x01.shape[0], F), jnp.float32)
        for corner in range(8):
            offs = np.array([(corner >> k) & 1 for k in range(3)], dtype=np.uint32)
            c = p0 + jnp.asarray(offs)[None, :]
            idx = ((c[:, 0] * primes[0])
                   ^ (c[:, 1] * primes[1])
                   ^ (c[:, 2] * primes[2]))
            idx = (idx & jnp.uint32(T - 1)).astype(jnp.int32)
            w = jnp.prod(jnp.where(jnp.asarray(offs)[None, :] == 1, frac, 1.0 - frac),
                         axis=-1, keepdims=True)
            acc = acc + w * table[lvl][idx]
        outs.append(acc)
    return jnp.concatenate(outs, axis=-1)


# ----------------------------------- full model ---------------------------------
@jax.jit
def ngp_forward(x, d, params):
    """Full NGP.forward (stage=0): returns (sigmas [N], rgbs [N,3])."""
    x01 = (x - XYZ_MIN) / (XYZ_MAX - XYZ_MIN)
    feat = hash_grid_encode(x01, params["hash_table"])
    return ngp_head_pallas(feat, d,
                           params["w_sig1"], params["w_sig2"],
                           params["w_rgb1"], params["w_rgb2"], params["w_rgb3"])


def init_params(key):
    k = jax.random.split(key, 6)
    # tcnn hash grid init: small uniform; MLP weights: no bias, fan-in scaled normal.
    hash_table = jax.random.uniform(k[0], (L, T, F), jnp.float32,
                                    minval=-1e-4, maxval=1e-4)
    w_sig1 = jax.random.normal(k[1], (FEAT_DIM, HIDDEN), jnp.float32) / np.sqrt(FEAT_DIM)
    w_sig2 = jax.random.normal(k[2], (HIDDEN, SIGMA_OUT), jnp.float32) / np.sqrt(HIDDEN)
    w_rgb1 = jax.random.normal(k[3], (SH_DIM + SIGMA_OUT, HIDDEN), jnp.float32) / np.sqrt(32)
    w_rgb2 = jax.random.normal(k[4], (HIDDEN, HIDDEN), jnp.float32) / np.sqrt(HIDDEN)
    w_rgb3 = jax.random.normal(k[5], (HIDDEN, 3), jnp.float32) / np.sqrt(HIDDEN)
    return dict(hash_table=hash_table, w_sig1=w_sig1, w_sig2=w_sig2,
                w_rgb1=w_rgb1, w_rgb2=w_rgb2, w_rgb3=w_rgb3)


if __name__ == "__main__":
    key = jax.random.PRNGKey(0)
    kp, kx, kd = jax.random.split(key, 3)

    params = init_params(kp)

    N = 256
    x = jax.random.uniform(kx, (N, 3), jnp.float32, minval=XYZ_MIN, maxval=XYZ_MAX)
    d = jax.random.normal(kd, (N, 3), jnp.float32)

    sigmas, rgbs = ngp_forward(x, d, params)
    sigmas, rgbs = jax.block_until_ready((sigmas, rgbs))

    assert sigmas.shape == (N,) and rgbs.shape == (N, 3)
    assert bool(jnp.all(jnp.isfinite(sigmas))) and bool(jnp.all(jnp.isfinite(rgbs)))
    assert bool(jnp.all((rgbs >= 0.0) & (rgbs <= 1.0)))
    print("KERNEL_OK")
</pallas_src>

<mosaic_0001>
module attributes {stable_mosaic.version = 11 : i64} {
  func.func @_ngp_head_kernel(%arg0: i32, %arg1: memref<32x128xbf16, #tpu.memory_space<vmem>>, %arg2: memref<3x128xf32, #tpu.memory_space<vmem>>, %arg3: memref<64x32xbf16, #tpu.memory_space<vmem>>, %arg4: memref<16x64xbf16, #tpu.memory_space<vmem>>, %arg5: memref<64x16xbf16, #tpu.memory_space<vmem>>, %arg6: memref<64x16xbf16, #tpu.memory_space<vmem>>, %arg7: memref<64x64xbf16, #tpu.memory_space<vmem>>, %arg8: memref<3x64xbf16, #tpu.memory_space<vmem>>, %arg9: memref<4x128xf32, #tpu.memory_space<vmem>>) attributes {dimension_semantics = [#tpu.dimension_semantics<parallel>], iteration_bounds = array<i64: 2>, scalar_prefetch = 0 : i64, scratch_operands = 0 : i64, tpu.core_type = #tpu.core_type<tc>, window_params = [{transform_indices = @transform_0, window_bounds = array<i64: 32, 128>}, {transform_indices = @transform_1, window_bounds = array<i64: 3, 128>}, {pipeline_mode = #tpu.pipeline_mode<synchronous>, transform_indices = @transform_2, window_bounds = array<i64: 64, 32>}, {pipeline_mode = #tpu.pipeline_mode<synchronous>, transform_indices = @transform_3, window_bounds = array<i64: 16, 64>}, {pipeline_mode = #tpu.pipeline_mode<synchronous>, transform_indices = @transform_4, window_bounds = array<i64: 64, 16>}, {pipeline_mode = #tpu.pipeline_mode<synchronous>, transform_indices = @transform_5, window_bounds = array<i64: 64, 16>}, {pipeline_mode = #tpu.pipeline_mode<synchronous>, transform_indices = @transform_6, window_bounds = array<i64: 64, 64>}, {pipeline_mode = #tpu.pipeline_mode<synchronous>, transform_indices = @transform_7, window_bounds = array<i64: 3, 64>}, {transform_indices = @transform_8, window_bounds = array<i64: 4, 128>}]} {
    %c0 = arith.constant 0 : index
    %c0_0 = arith.constant 0 : index
    %0 = vector.load %arg1[%c0, %c0_0] : memref<32x128xbf16, #tpu.memory_space<vmem>>, vector<32x128xbf16>
    %c0_1 = arith.constant 0 : index
    %c0_2 = arith.constant 0 : index
    %1 = vector.load %arg3[%c0_1, %c0_2] : memref<64x32xbf16, #tpu.memory_space<vmem>>, vector<64x32xbf16>
    %cst = arith.constant dense<0.000000e+00> : vector<64x128xf32>
    %2 = tpu.matmul %1, %0, %cst {dimension_numbers = #tpu.dot_dimension_numbers<[1], [0], [0], [1], [0, 0, 1, 1], [], []>} : vector<64x32xbf16>, vector<32x128xbf16>, vector<64x128xf32> -> vector<64x128xf32>
    %cst_3 = arith.constant 0.000000e+00 : f32
    %3 = vector.broadcast %cst_3 : f32 to vector<64x128xf32>
    %4 = arith.maximumf %2, %3 : vector<64x128xf32>
    %5 = arith.truncf %4 : vector<64x128xf32> to vector<64x128xbf16>
    %c0_4 = arith.constant 0 : index
    %c0_5 = arith.constant 0 : index
    %6 = vector.load %arg4[%c0_4, %c0_5] : memref<16x64xbf16, #tpu.memory_space<vmem>>, vector<16x64xbf16>
    %cst_6 = arith.constant dense<0.000000e+00> : vector<16x128xf32>
    %7 = tpu.matmul %6, %5, %cst_6 {dimension_numbers = #tpu.dot_dimension_numbers<[1], [0], [0], [1], [0, 0, 1, 1], [], []>} : vector<16x64xbf16>, vector<64x128xbf16>, vector<16x128xf32> -> vector<16x128xf32>
    %8 = vector.extract_strided_slice %7 {offsets = [0, 0], sizes = [1, 128], strides = [1, 1]} : vector<16x128xf32> to vector<1x128xf32>
    %9 = math.exp %8 : vector<1x128xf32>
    %c0_7 = arith.constant 0 : index
    %c0_8 = arith.constant 0 : index
    %10 = vector.load %arg2[%c0_7, %c0_8] : memref<3x128xf32, #tpu.memory_space<vmem>>, vector<3x128xf32>
    %11 = vector.extract_strided_slice %10 {offsets = [0, 0], sizes = [1, 128], strides = [1, 1]} : vector<3x128xf32> to vector<1x128xf32>
    %12 = vector.extract_strided_slice %10 {offsets = [1, 0], sizes = [1, 128], strides = [1, 1]} : vector<3x128xf32> to vector<1x128xf32>
    %13 = vector.extract_strided_slice %10 {offsets = [2, 0], sizes = [1, 128], strides = [1, 1]} : vector<3x128xf32> to vector<1x128xf32>
    %14 = arith.mulf %11, %11 : vector<1x128xf32>
    %15 = arith.mulf %12, %12 : vector<1x128xf32>
    %16 = arith.addf %14, %15 : vector<1x128xf32>
    %17 = arith.mulf %13, %13 : vector<1x128xf32>
    %18 = arith.addf %16, %17 : vector<1x128xf32>
    %19 = math.rsqrt %18 : vector<1x128xf32>
    %20 = arith.mulf %11, %19 : vector<1x128xf32>
    %21 = arith.mulf %12, %19 : vector<1x128xf32>
    %22 = arith.mulf %13, %19 : vector<1x128xf32>
    %23 = arith.mulf %20, %21 : vector<1x128xf32>
    %24 = arith.mulf %20, %22 : vector<1x128xf32>
    %25 = arith.mulf %21, %22 : vector<1x128xf32>
    %26 = arith.mulf %20, %20 : vector<1x128xf32>
    %27 = arith.mulf %21, %21 : vector<1x128xf32>
    %28 = arith.mulf %22, %22 : vector<1x128xf32>
    %cst_9 = arith.constant 0.282094806 : f32
    %29 = vector.broadcast %cst_9 : f32 to vector<1x128xf32>
    %cst_10 = arith.constant -0.488602519 : f32
    %30 = vector.broadcast %cst_10 : f32 to vector<1x128xf32>
    %31 = arith.mulf %30, %21 : vector<1x128xf32>
    %cst_11 = arith.constant 0.488602519 : f32
    %32 = vector.broadcast %cst_11 : f32 to vector<1x128xf32>
    %33 = arith.mulf %32, %22 : vector<1x128xf32>
    %cst_12 = arith.constant -0.488602519 : f32
    %34 = vector.broadcast %cst_12 : f32 to vector<1x128xf32>
    %35 = arith.mulf %34, %20 : vector<1x128xf32>
    %cst_13 = arith.constant 1.09254849 : f32
    %36 = vector.broadcast %cst_13 : f32 to vector<1x128xf32>
    %37 = arith.mulf %36, %23 : vector<1x128xf32>
    %cst_14 = arith.constant -1.09254849 : f32
    %38 = vector.broadcast %cst_14 : f32 to vector<1x128xf32>
    %39 = arith.mulf %38, %25 : vector<1x128xf32>
    %cst_15 = arith.constant 0.946174681 : f32
    %40 = vector.broadcast %cst_15 : f32 to vector<1x128xf32>
    %41 = arith.mulf %40, %28 : vector<1x128xf32>
    %cst_16 = arith.constant 0.31539157 : f32
    %42 = vector.broadcast %cst_16 : f32 to vector<1x128xf32>
    %43 = arith.subf %41, %42 : vector<1x128xf32>
    %cst_17 = arith.constant -1.09254849 : f32
    %44 = vector.broadcast %cst_17 : f32 to vector<1x128xf32>
    %45 = arith.mulf %44, %24 : vector<1x128xf32>
    %46 = arith.subf %26, %27 : vector<1x128xf32>
    %cst_18 = arith.constant 0.546274245 : f32
    %47 = vector.broadcast %cst_18 : f32 to vector<1x128xf32>
    %48 = arith.mulf %47, %46 : vector<1x128xf32>
    %cst_19 = arith.constant 0.590043604 : f32
    %49 = vector.broadcast %cst_19 : f32 to vector<1x128xf32>
    %50 = arith.mulf %49, %21 : vector<1x128xf32>
    %cst_20 = arith.constant -3.000000e+00 : f32
    %51 = vector.broadcast %cst_20 : f32 to vector<1x128xf32>
    %52 = arith.mulf %51, %26 : vector<1x128xf32>
    %53 = arith.addf %52, %27 : vector<1x128xf32>
    %54 = arith.mulf %50, %53 : vector<1x128xf32>
    %cst_21 = arith.constant 2.89061141 : f32
    %55 = vector.broadcast %cst_21 : f32 to vector<1x128xf32>
    %56 = arith.mulf %55, %23 : vector<1x128xf32>
    %57 = arith.mulf %56, %22 : vector<1x128xf32>
    %cst_22 = arith.constant 0.457045794 : f32
    %58 = vector.broadcast %cst_22 : f32 to vector<1x128xf32>
    %59 = arith.mulf %58, %21 : vector<1x128xf32>
    %cst_23 = arith.constant 5.000000e+00 : f32
    %60 = vector.broadcast %cst_23 : f32 to vector<1x128xf32>
    %61 = arith.mulf %60, %28 : vector<1x128xf32>
    %cst_24 = arith.constant 1.000000e+00 : f32
    %62 = vector.broadcast %cst_24 : f32 to vector<1x128xf32>
    %63 = arith.subf %62, %61 : vector<1x128xf32>
    %64 = arith.mulf %59, %63 : vector<1x128xf32>
    %cst_25 = arith.constant 0.373176336 : f32
    %65 = vector.broadcast %cst_25 : f32 to vector<1x128xf32>
    %66 = arith.mulf %65, %22 : vector<1x128xf32>
    %cst_26 = arith.constant 5.000000e+00 : f32
    %67 = vector.broadcast %cst_26 : f32 to vector<1x128xf32>
    %68 = arith.mulf %67, %28 : vector<1x128xf32>
    %cst_27 = arith.constant 3.000000e+00 : f32
    %69 = vector.broadcast %cst_27 : f32 to vector<1x128xf32>
    %70 = arith.subf %68, %69 : vector<1x128xf32>
    %71 = arith.mulf %66, %70 : vector<1x128xf32>
    %cst_28 = arith.constant 0.457045794 : f32
    %72 = vector.broadcast %cst_28 : f32 to vector<1x128xf32>
    %73 = arith.mulf %72, %20 : vector<1x128xf32>
    %cst_29 = arith.constant 5.000000e+00 : f32
    %74 = vector.broadcast %cst_29 : f32 to vector<1x128xf32>
    %75 = arith.mulf %74, %28 : vector<1x128xf32>
    %cst_30 = arith.constant 1.000000e+00 : f32
    %76 = vector.broadcast %cst_30 : f32 to vector<1x128xf32>
    %77 = arith.subf %76, %75 : vector<1x128xf32>
    %78 = arith.mulf %73, %77 : vector<1x128xf32>
    %cst_31 = arith.constant 1.44530571 : f32
    %79 = vector.broadcast %cst_31 : f32 to vector<1x128xf32>
    %80 = arith.mulf %79, %22 : vector<1x128xf32>
    %81 = arith.subf %26, %27 : vector<1x128xf32>
    %82 = arith.mulf %80, %81 : vector<1x128xf32>
    %cst_32 = arith.constant 0.590043604 : f32
    %83 = vector.broadcast %cst_32 : f32 to vector<1x128xf32>
    %84 = arith.mulf %83, %20 : vector<1x128xf32>
    %cst_33 = arith.constant 0.000000e+00 : f32
    %85 = vector.broadcast %cst_33 : f32 to vector<1x128xf32>
    %86 = arith.subf %85, %26 : vector<1x128xf32>
    %cst_34 = arith.constant 3.000000e+00 : f32
    %87 = vector.broadcast %cst_34 : f32 to vector<1x128xf32>
    %88 = arith.mulf %87, %27 : vector<1x128xf32>
    %89 = arith.addf %86, %88 : vector<1x128xf32>
    %90 = arith.mulf %84, %89 : vector<1x128xf32>
    %91 = tpu.concatenate %29, %31, %33, %35, %37, %39, %43, %45, %48, %54, %57, %64, %71, %78, %82, %90 in 0 : vector<1x128xf32>, vector<1x128xf32>, vector<1x128xf32>, vector<1x128xf32>, vector<1x128xf32>, vector<1x128xf32>, vector<1x128xf32>, vector<1x128xf32>, vector<1x128xf32>, vector<1x128xf32>, vector<1x128xf32>, vector<1x128xf32>, vector<1x128xf32>, vector<1x128xf32>, vector<1x128xf32>, vector<1x128xf32> -> vector<16x128xf32>
    %c0_35 = arith.constant 0 : index
    %c0_36 = arith.constant 0 : index
    %92 = vector.load %arg5[%c0_35, %c0_36] : memref<64x16xbf16, #tpu.memory_space<vmem>>, vector<64x16xbf16>
    %93 = arith.truncf %91 : vector<16x128xf32> to vector<16x128xbf16>
    %cst_37 = arith.constant dense<0.000000e+00> : vector<64x128xf32>
    %94 = tpu.matmul %92, %93, %cst_37 {dimension_numbers = #tpu.dot_dimension_numbers<[1], [0], [0], [1], [0, 0, 1, 1], [], []>} : vector<64x16xbf16>, vector<16x128xbf16>, vector<64x128xf32> -> vector<64x128xf32>
    %c0_38 = arith.constant 0 : index
    %c0_39 = arith.constant 0 : index
    %95 = vector.load %arg6[%c0_38, %c0_39] : memref<64x16xbf16, #tpu.memory_space<vmem>>, vector<64x16xbf16>
    %96 = arith.truncf %7 : vector<16x128xf32> to vector<16x128xbf16>
    %cst_40 = arith.constant dense<0.000000e+00> : vector<64x128xf32>
    %97 = tpu.matmul %95, %96, %cst_40 {dimension_numbers = #tpu.dot_dimension_numbers<[1], [0], [0], [1], [0, 0, 1, 1], [], []>} : vector<64x16xbf16>, vector<16x128xbf16>, vector<64x128xf32> -> vector<64x128xf32>
    %98 = arith.addf %94, %97 : vector<64x128xf32>
    %cst_41 = arith.constant 0.000000e+00 : f32
    %99 = vector.broadcast %cst_41 : f32 to vector<64x128xf32>
    %100 = arith.maximumf %98, %99 : vector<64x128xf32>
    %101 = arith.truncf %100 : vector<64x128xf32> to vector<64x128xbf16>
    %c0_42 = arith.constant 0 : index
    %c0_43 = arith.constant 0 : index
    %102 = vector.load %arg7[%c0_42, %c0_43] : memref<64x64xbf16, #tpu.memory_space<vmem>>, vector<64x64xbf16>
    %cst_44 = arith.constant dense<0.000000e+00> : vector<64x128xf32>
    %103 = tpu.matmul %102, %101, %cst_44 {dimension_numbers = #tpu.dot_dimension_numbers<[1], [0], [0], [1], [0, 0, 1, 1], [], []>} : vector<64x64xbf16>, vector<64x128xbf16>, vector<64x128xf32> -> vector<64x128xf32>
    %cst_45 = arith.constant 0.000000e+00 : f32
    %104 = vector.broadcast %cst_45 : f32 to vector<64x128xf32>
    %105 = arith.maximumf %103, %104 : vector<64x128xf32>
    %c0_46 = arith.constant 0 : index
    %c0_47 = arith.constant 0 : index
    %106 = vector.load %arg8[%c0_46, %c0_47] : memref<3x64xbf16, #tpu.memory_space<vmem>>, vector<3x64xbf16>
    %107 = arith.truncf %105 : vector<64x128xf32> to vector<64x128xbf16>
    %cst_48 = arith.constant dense<0.000000e+00> : vector<3x128xf32>
    %108 = tpu.matmul %106, %107, %cst_48 {dimension_numbers = #tpu.dot_dimension_numbers<[1], [0], [0], [1], [0, 0, 1, 1], [], []>} : vector<3x64xbf16>, vector<64x128xbf16>, vector<3x128xf32> -> vector<3x128xf32>
    %cst_49 = arith.constant 0.000000e+00 : f32
    %109 = vector.broadcast %cst_49 : f32 to vector<3x128xf32>
    %110 = arith.subf %109, %108 : vector<3x128xf32>
    %111 = math.exp %110 : vector<3x128xf32>
    %cst_50 = arith.constant 1.000000e+00 : f32
    %112 = vector.broadcast %cst_50 : f32 to vector<3x128xf32>
    %113 = arith.addf %112, %111 : vector<3x128xf32>
    %cst_51 = arith.constant 1.000000e+00 : f32
    %114 = vector.broadcast %cst_51 : f32 to vector<3x128xf32>
    %115 = arith.divf %114, %113 : vector<3x128xf32>
    %116 = tpu.concatenate %9, %115 in 0 : vector<1x128xf32>, vector<3x128xf32> -> vector<4x128xf32>
    %c0_52 = arith.constant 0 : index
    %c0_53 = arith.constant 0 : index
    %117 = vector.load %arg9[%c0_52, %c0_53] : memref<4x128xf32, #tpu.memory_space<vmem>>, vector<4x128xf32>
    tpu.vector_store %arg9[%c0_52, %c0_53], %116 {strides = array<i32>} : memref<4x128xf32, #tpu.memory_space<vmem>>, vector<4x128xf32>,
    return
  }
  func.func @transform_0(%arg0: i32) -> (i32, i32) {
    %c0_i32 = arith.constant 0 : i32
    %c0_i32_0 = arith.constant 0 : i32
    return %c0_i32, %arg0 : i32, i32
  }
  func.func @transform_1(%arg0: i32) -> (i32, i32) {
    %c0_i32 = arith.constant 0 : i32
    %c0_i32_0 = arith.constant 0 : i32
    return %c0_i32, %arg0 : i32, i32
  }
  func.func @transform_2(%arg0: i32) -> (i32, i32) {
    %c0_i32 = arith.constant 0 : i32
    %c0_i32_0 = arith.constant 0 : i32
    %c0_i32_1 = arith.constant 0 : i32
    return %c0_i32, %c0_i32_0 : i32, i32
  }
  func.func @transform_3(%arg0: i32) -> (i32, i32) {
    %c0_i32 = arith.constant 0 : i32
    %c0_i32_0 = arith.constant 0 : i32
    %c0_i32_1 = arith.constant 0 : i32
    return %c0_i32, %c0_i32_0 : i32, i32
  }
  func.func @transform_4(%arg0: i32) -> (i32, i32) {
    %c0_i32 = arith.constant 0 : i32
    %c0_i32_0 = arith.constant 0 : i32
    %c0_i32_1 = arith.constant 0 : i32
    return %c0_i32, %c0_i32_0 : i32, i32
  }
  func.func @transform_5(%arg0: i32) -> (i32, i32) {
    %c0_i32 = arith.constant 0 : i32
    %c0_i32_0 = arith.constant 0 : i32
    %c0_i32_1 = arith.constant 0 : i32
    return %c0_i32, %c0_i32_0 : i32, i32
  }
  func.func @transform_6(%arg0: i32) -> (i32, i32) {
    %c0_i32 = arith.constant 0 : i32
    %c0_i32_0 = arith.constant 0 : i32
    %c0_i32_1 = arith.constant 0 : i32
    return %c0_i32, %c0_i32_0 : i32, i32
  }
  func.func @transform_7(%arg0: i32) -> (i32, i32) {
    %c0_i32 = arith.constant 0 : i32
    %c0_i32_0 = arith.constant 0 : i32
    %c0_i32_1 = arith.constant 0 : i32
    return %c0_i32, %c0_i32_0 : i32, i32
  }
  func.func @transform_8(%arg0: i32) -> (i32, i32) {
    %c0_i32 = arith.constant 0 : i32
    %c0_i32_0 = arith.constant 0 : i32
    return %c0_i32, %arg0 : i32, i32
  }
}

</mosaic_0001>

<bundles_post_ra>
// kernel: ngp_forward.1
= control target key start
LH: loop header
LB: loop body
LE: loop exit
PB: predicated region body
PF: predicated region fallthrough
CT: control target
= control target key end

     0   :  { %s1455_s27 = smov 0   ;;  %s1457_s28 = smov 0   ;;  %s1606_s0 = inlined_call_operand.vmem [shape: bf16[32,256], index: 0, kind: input, shape index: {}]   ;;  %s1607_s1 = inlined_call_operand.vmem [shape: f32[3,256], index: 1, kind: input, shape index: {}]   ;;  %s1608_s2 = inlined_call_operand.vmem [shape: bf16[64,32], index: 2, kind: input, shape index: {}]   ;;  %s1609_s3 = inlined_call_operand.vmem [shape: bf16[16,64], index: 3, kind: input, shape index: {}]   ;;  %s1610_s4 = inlined_call_operand.vmem [shape: bf16[64,16], index: 4, kind: input, shape index: {}]   ;;  %s1611_s5 = inlined_call_operand.vmem [shape: bf16[64,16], index: 5, kind: input, shape index: {}]   ;;  %s1612_s6 = inlined_call_operand.vmem [shape: bf16[64,64], index: 6, kind: input, shape index: {}]   ;;  %s1613_s7 = inlined_call_operand.vmem [shape: bf16[3,64], index: 7, kind: input, shape index: {}]   ;;  %s1614_s8 = inlined_call_operand.vmem [shape: f32[4,256], index: 8, kind: output, shape index: {}]  }
   0x1   :  { %s1459_s29 = smov 0  }
   0x2 LB: > { %s1166_s30 = sadd.s32 4294967295, %s1406_s29   ;;  %s1472_s9 = sadd.s32 1, %s1406_s29   ;;  %s1406_s29 = sphi %s1459_s29, %s1617_s29   ;;  %s1402_s28 = sphi %s1457_s28, %s1616_s28   ;;  %s1398_s27 = sphi %s1455_s27, %s1615_s27  }
   0x3   : > { %s22_s10 = ssub.s32 %s1406_s29, %s1472_s9  ;;  %s25_s11 = sadd.s32 1, %s1402_s28 }
   0x4   : > { %p23_p0 = scmp.eq.s32.totalorder %s22_s10, 0  ;;  %p32_p1 = scmp.ne.s32.totalorder %s1402_s28, %s1398_s27 }
   0x5   : > { %p33_p2 = scmp.eq.s32.totalorder %s1406_s29, 0  ;;  %p1169_p4 = scmp.ge.s32.totalorder %s1406_s29, 2 }
   0x6   : > { %s1481_s12 = scalar_select %p23_p0, %s1402_s28, %s25_s11  }
   0x7   : > { %p34_p3 = por %p33_p2, %p32_p1  ;;  %254 = sbr.rel (%p1169_p4) target bundleno = 21 (0x15), region = 40 }
   0xe   : > { %257 = sbr.rel (!%p34_p3) target bundleno = 21 (0x15), region = 44  ;;  %s259_s13 = sand.u32 (%p34_p3), 1, %s1402_s28  }
   0xf   : > { %s1171_s14 = sshll.u32 (%p34_p3), %s1406_s29, 2  ;;  %s1170_s15 = sshll.u32 (%p34_p3), %s259_s13, 4 }
  0x10   : > { %s263_s18 = scalar_lea.vmem (%p34_p3), %s1606_s0, %s1171_s14  ;;  %s261_s19 = scalar_lea.vmem (%p34_p3), [#allocation2], %s1170_s15 }
  0x11   : > { %v279_v0 = vld [vmem:[%s263_s18] sm:$0xf] (%p34_p3)  ;;  %v281_v1 = vld [vmem:[%s263_s18 + $0x8] sm:$0xf] (%p34_p3)  ;;  %v283_v2 = vld [vmem:[%s263_s18 + $0x10] sm:$0xf] (%p34_p3) }
  0x12   : > { %280 = vst [vmem:[%s261_s19] sm:$0xf] (%p34_p3), %v279_v0  ;;  %282 = vst [vmem:[%s261_s19 + $0x4] sm:$0xf] (%p34_p3), %v281_v1  ;;  %v285_v3 = vld [vmem:[%s263_s18 + $0x18] sm:$0xf] (%p34_p3) }
  0x13   : > { %284 = vst [vmem:[%s261_s19 + $0x8] sm:$0xf] (%p34_p3), %v283_v2  ;;  %286 = vst [vmem:[%s261_s19 + $0xc] sm:$0xf] (%p34_p3), %v285_v3 }
  0x15 PF: > { %p1172_p5 = scmp.ge.s32.totalorder %s1406_s29, 1  ;;  %p323_p6 = scmp.lt.s32.totalorder %s1406_s29, 3 }
  0x17   : > { %p324_p7 = pnand %p1172_p5, %p323_p6 }
  0x18   : > { %s330_s20 = sand.u32 (!%p324_p7), 1, %s1398_s27   ;;  %v1359_v4 = vld [vmem:[%s1608_s2] sm:$0xff] (!%p324_p7)   ;;  %vm419_vm0 = vcmask (!%p324_p7), 261120   ;;  %v1360_v7 = vld [vmem:[%s1608_s2 + $0x8] sm:$0xff] (!%p324_p7)   ;;  %v1361_v8 = vld [vmem:[%s1608_s2 + $0x10] sm:$0xff] (!%p324_p7)   ;;  %v1408_v10 = vmov (!%p324_p7), 0.0  }
  0x19   : > { %327 = sbr.rel (%p324_p7) target bundleno = 1219 (0x4c3), region = 89  ;;  %s1173_s23 = sshll.u32 (!%p324_p7), %s330_s20, 4  ;;  %1255 = vmatprep.mubr.msk.bf16.mxu0 (!%p324_p7), %vm419_vm0, %v1359_v4  ;;  %v1362_v9 = vld [vmem:[%s1608_s2 + $0x18] sm:$0xff] (!%p324_p7)   ;;  %1263 = vmatprep.subr.bf16.mxu1 (!%p324_p7), %v1408_v10  ;;  %vm1409_vm1 = vmmov (!%p324_p7), 0   ;;  %v1363_v31 = vld [vmem:[%s1609_s3] sm:$0xff] (!%p324_p7)   ;;  %vm516_vm2 = vcmask (!%p324_p7), 523264  }
  0x1a   : > { %s332_s24 = scalar_lea.vmem (!%p324_p7), [#allocation2], %s1173_s23  ;;  %1271 = vmatprep.mubr.msk.bf16.mxu1 (!%p324_p7), %vm1409_vm1, %v1408_v10  ;;  %v1364_v32 = vld [vmem:[%s1611_s5] sm:$0xff] (!%p324_p7)   ;;  %vm736_vm3 = vcmask (!%p324_p7), 130048   ;;  %p366_p8 = scmp.lt.s32.totalorder (!%p324_p7), %s1166_s30, 1  ;;  %vm677_vm4 = vcmask (!%p324_p7), 1040384   ;;  %vm679_vm5 = vcmask (!%p324_p7), 1041408  }
  0x1b   : > { %v1357_v5 = vld [vmem:[%s332_s24] sm:$0xff] (!%p324_p7)   ;;  %v1358_v6 = vld [vmem:[%s332_s24 + $0x8] sm:$0xff] (!%p324_p7)   ;;  %vm681_vm6 = vcmask (!%p324_p7), 1042432   ;;  %vm683_vm7 = vcmask (!%p324_p7), 1043456   ;;  %vm685_vm8 = vcmask (!%p324_p7), 1044480   ;;  %vm687_vm9 = vcmask (!%p324_p7), 1045504  }
  0x1c   : > { %1251 = vmatprep.subr.bf16.mxu0 (!%p324_p7), %v1357_v5  ;;  %vm689_vm10 = vcmask (!%p324_p7), 1046528  }
  0x1d   : > { %1252 = vmatpush3.bf16.msra.mxu0 (!%p324_p7), %v1357_v5 }
  0x1e   : > { %1253 = vmatprep.subr.bf16.mxu0 (!%p324_p7), %v1358_v6 }
  0x20   : > { %s1619_s30 = smov (!%p366_p8, %s1166_s30), 1 }
  0x21   : > { %1254 = vmatpush3.bf16.msra.mxu0 %v1358_v6  ;;  %s1174_s18 = sshll.u32 %s1619_s30, 2 }
  0x22   : > { %s369_s21 = scalar_lea.vmem %s1607_s1, %s1174_s18  ;;  %s373_s13 = scalar_lea.vmem %s1614_s8, %s1174_s18 }
  0x23   : > { %v563_v33 = vld [vmem:[%s369_s21] sm:$0x7] }
  0x24   : > { %1256 = vmatmul.mubr.msk.bf16.vlgmr.msra.gmra.mrb[0].mxu0 %vm419_vm0, %v1360_v7  ;;  %v564_v34 = vmul.f32 %v563_v33, %v563_v33 }
  0x25   : > { %1259 = vmatprep.mubr.msk.bf16.mxu0 %vm419_vm0, %v1361_v8 }
  0x26   : > { %v566_v35 = vrot.slane %v564_v34, 1  ;;  %v569_v37 = vrot.slane %v564_v34, 2 }
  0x28   : > { %v568_v36 = vadd.f32 %v566_v35, %v564_v34 }
  0x2a   : > { %v571_v38 = vadd.f32 %v569_v37, %v568_v36 }
  0x2c   : > { %1260 = vmatmul.mubr.msk.bf16.gmra.mrb[4].mxu0 %vm419_vm0, %v1362_v9  ;;  %1376 = vrsqrt.f32 %v571_v38 }
  0x2d   : > { %1277 = vmatprep.mubr.msk.bf16.mxu0 %vm736_vm3, %v1364_v32 }
  0x36   : > { %v1377_v39 = vpop.eup %1376 }
  0x37   : > { %v575_v40 = vrot.slane %v1377_v39, 7  ;;  %v578_v41 = vrot.slane %v1377_v39, 6  ;;  %v573_v42 = vmul.f32 %v1377_v39, %v563_v33 }
  0x39   : > { %v577_v43 = vmul.f32 %v575_v40, %v563_v33  ;;  %v580_v44 = vmul.f32 %v578_v41, %v563_v33  ;;  %v592_v45 = vmul.f32 %v573_v42, %v573_v42  ;;  %v597_v5 = vmul.f32 -0.48860252, %v573_v42 }
  0x3b   : > { %v593_v46 = vmul.f32 %v577_v43, %v577_v43  ;;  %v594_v47 = vmul.f32 %v580_v44, %v580_v44  ;;  %v582_v48 = vrot.slane %v577_v43, 1  ;;  %v609_v50 = vmul.f32 -3.0, %v592_v45 }
  0x3c   : > { %v586_v55 = vrot.slane %v580_v44, 2  ;;  %v608_v58 = vmul.f32 0.5900436, %v577_v43  ;;  %v617_v60 = vmul.f32 0.4570458, %v577_v43  ;;  %v589_v62 = vrot.slane %v580_v44, 1 }
  0x3d   : > { %v604_v49 = vrot.slane %v593_v46, 1  ;;  %v618_v51 = vmul.f32 5.0, %v594_v47  ;;  %v584_v52 = vmul.f32 %v582_v48, %v573_v42  ;;  %v595_v0 = vmul.f32 -0.48860252, %v577_v43 }
  0x3e   : > { %v624_v3 = vmul.f32 0.37317634, %v580_v44  ;;  %v638_v7 = vmul.f32 3.0, %v593_v46  ;;  %v591_v8 = vmul.f32 %v589_v62, %v577_v43  ;;  %v596_v9 = vmul.f32 0.48860252, %v580_v44  ;;  %v1367_v62 = vld [vmem:[%s1611_s5 + $0x18] sm:$0xff]  }
  0x3f   : > { %v610_v53 = vadd.f32 %v609_v50, %v604_v49  ;;  %v619_v54 = vsub.f32 1.0, %v618_v51  ;;  %v615_v56 = vmul.f32 2.8906114, %v584_v52  ;;  %v606_v57 = vsub.f32 %v592_v45, %v604_v49 }
  0x40   : > { %v1189_v4 = vadd.f32 -3.0, %v618_v51 }
  0x41   : > { %v612_v59 = vrot.slane %v610_v53, 7  ;;  %v621_v61 = vrot.slane %v619_v54, 1  ;;  %v616_v63 = vmul.f32 %v615_v56, %v586_v55  ;;  %v607_v1 = vmul.f32 0.54627424, %v606_v57 }
  0x43   : > { %v614_v2 = vmul.f32 %v612_v59, %v608_v58  ;;  %v623_v6 = vmul.f32 %v621_v61, %v617_v60  ;;  %v1365_v60 = vld [vmem:[%s1611_s5 + $0x8] sm:$0xff]   ;;  %v1366_v61 = vld [vmem:[%s1611_s5 + $0x10] sm:$0xff]  }
  0xf7   : > { %v1257_v11 = vpop.f32.mrb[0].mxu0 }
  0xf8   : > { %v466_v12 = vpop.f32.mrb[1].mxu0  ;;  %v499_v14 = vmax.f32 %v1257_v11, 0.0  ;;  %v627_v11 = vmul.f32 0.4570458, %v573_v42 }
  0xf9   : > { %v1258_v13 = vpop.f32.mrb[2].mxu0  ;;  %v497_v17 = vmax.f32 %v466_v12, 0.0  ;;  %v660_v12 = vrot.slane %v616_v63, 6  ;;  %v1368_v63 = vld [vmem:[%s1610_s4] sm:$0xff]  }
  0xfa   : > { %v500_v15 = vmax.f32 %v1258_v13, 0.0  ;;  %v469_v16 = vpop.f32.mrb[3].mxu0  ;;  %v628_v13 = vrot.slane %v619_v54, 2 }
  0xfb   : > { %v498_v18 = vmax.f32 %v469_v16, 0.0  ;;  %v598_v16 = vmul.f32 1.0925485, %v584_v52 }
  0xfc   : > { %v506_v19 = vpack.c.bf16 %v500_v15, %v499_v14  ;;  %v678_v14 = vsel %vm677_vm4, 0.2820948, %v595_v0  ;;  %v691_v15 = vsel %vm677_vm4, %v607_v1, %v614_v2  ;;  %v1369_v0 = vld [vmem:[%s1610_s4 + $0x8] sm:$0xff]   ;;  %v1370_v1 = vld [vmem:[%s1610_s4 + $0x10] sm:$0xff]   ;;  %v1371_v2 = vld [vmem:[%s1610_s4 + $0x18] sm:$0xff]  }
  0xfd   : > { %v505_v20 = vpack.c.bf16 %v498_v18, %v497_v17  ;;  %v600_v17 = vmul.f32 0.9461747, %v594_v47  ;;  %v626_v18 = vmul.f32 %v1189_v4, %v624_v3  ;;  %v1372_v3 = vld [vmem:[%s1612_s6] sm:$0xff]  }
  0xff   : > { %v1261_v21 = vpop.f32.mrb[4].mxu0  ;;  %1264 = vmatpush3.bf16.msra.mxu1 %v505_v20  ;;  %v637_v20 = vsub.f32 0.0, %v592_v45  ;;  %v666_v32 = vrot.slane %v626_v18, 6  ;;  %v1188_v36 = vadd.f32 -0.31539157, %v600_v17 }
 0x100   : > { %v482_v22 = vpop.f32.mrb[5].mxu0  ;;  %1265 = vmatprep.subr.bf16.mxu1 %v1408_v10  ;;  %v503_v24 = vmax.f32 %v1261_v21, 0.0  ;;  %v640_v21 = vrot.slane %v638_v7, 1 }
 0x101   : > { %v1262_v23 = vpop.f32.mrb[6].mxu0  ;;  %v501_v27 = vmax.f32 %v482_v22, 0.0  ;;  %v645_v22 = vrot.slane %v597_v5, 5  ;;  %v654_v45 = vrot.slane %v1188_v36, 4 }
 0x102   : > { %v504_v25 = vmax.f32 %v1262_v23, 0.0  ;;  %v485_v26 = vpop.f32.mrb[7].mxu0  ;;  %v663_v23 = vrot.slane %v623_v6, 6  ;;  %v642_v33 = vadd.f32 %v640_v21, %v637_v20 }
 0x103   : > { %v502_v28 = vmax.f32 %v485_v26, 0.0  ;;  %1266 = vmatpush3.bf16.msra.mxu1 %v506_v19  ;;  %v633_v19 = vrot.slane %v606_v57, 6  ;;  %v692_v26 = vsel %vm679_vm5, %v691_v15, %v660_v12 }
 0x104   : > { %v508_v29 = vpack.c.bf16 %v504_v25, %v503_v24  ;;  %1267 = vmatprep.subr.bf16.mxu1 %v1408_v10  ;;  %v631_v24 = vmul.f32 1.4453057, %v580_v44  ;;  %v680_v25 = vsel %vm679_vm5, %v678_v14, %v596_v9  ;;  %v693_v35 = vsel %vm681_vm6, %v692_v26, %v663_v23  ;;  %v1374_v26 = vld [vmem:[%s1612_s6 + $0x10] sm:$0xff]  }
 0x105   : > { %v507_v30 = vpack.c.bf16 %v502_v28, %v501_v27  ;;  %v599_v27 = vmul.f32 -1.0925485, %v591_v8  ;;  %v630_v28 = vmul.f32 %v628_v13, %v627_v11  ;;  %v682_v34 = vsel %vm681_vm6, %v680_v25, %v645_v22  ;;  %v1373_v25 = vld [vmem:[%s1612_s6 + $0x8] sm:$0xff]  }
 0x106   : > { %v635_v37 = vmul.f32 %v633_v19, %v631_v24  ;;  %v694_v41 = vsel %vm683_vm7, %v693_v35, %v666_v32 }
 0x107   : > { %1268 = vmatpush3.bf16.msra.mxu1 %v507_v30  ;;  %v636_v30 = vmul.f32 0.5900436, %v573_v42  ;;  %v651_v38 = vrot.slane %v599_v27, 4  ;;  %v669_v39 = vrot.slane %v630_v28, 3  ;;  %v1375_v27 = vld [vmem:[%s1612_s6 + $0x18] sm:$0xff]  }
 0x108   : > { %1269 = vmatprep.subr.bf16.mxu1 %v1408_v10  ;;  %v672_v46 = vrot.slane %v635_v37, 4 }
 0x109   : > { %v643_v44 = vmul.f32 %v642_v33, %v636_v30 }
 0x10b   : > { %1270 = vmatpush3.bf16.msra.mxu1 %v508_v29  ;;  %v588_v29 = vmul.f32 %v586_v55, %v573_v42  ;;  %v695_v42 = vsel %vm685_vm8, %v694_v41, %v669_v39  ;;  %v675_v49 = vrot.slane %v643_v44, 1 }
 0x10c   : > { %v696_v51 = vsel %vm687_vm9, %v695_v42, %v672_v46 }
 0x10d   : > { %v602_v43 = vmul.f32 -1.0925485, %v588_v29  ;;  %v697_v54 = vsel %vm689_vm10, %v696_v51, %v675_v49 }
 0x10e   : > { %1272 = vmatmul.mubr.msk.bf16.vlgmr.msra.gmra.mrb[0].mxu1 %vm516_vm2, %v1363_v31  ;;  %v648_v31 = vrot.slane %v598_v16, 4 }
 0x10f   : > { %v657_v48 = vrot.slane %v602_v43, 1  ;;  %1303 = vmatprep.mubr.msk.bf16.mxu1 %vm516_vm2, %v1372_v3 }
 0x110   : > { %v684_v40 = vsel %vm683_vm7, %v682_v34, %v648_v31 }
 0x111   : > { %v686_v47 = vsel %vm685_vm8, %v684_v40, %v651_v38 }
 0x112   : > { %v688_v50 = vsel %vm687_vm9, %v686_v47, %v654_v45 }
 0x113   : > { %v690_v53 = vsel %vm689_vm10, %v688_v50, %v657_v48  ;;  %v1036_v48 = vld [vmem:[%s1613_s7] sm:$0x3] }
 0x114   : > { %v706_v59 = vpack.c.bf16 %v697_v54, %v690_v53 }
 0x1e1   : > { %v1532_v52 = vpop.f32.mrb[0].mxu1 }
 0x1e2   : > { %v1273_v55 = vpop.f32.mrb[1].mxu1 }
 0x1e3   : > { %v557_v56 = vpop.f32.mrb[2].mxu1 }
 0x1e4   : > { %v715_v57 = vpack.c.bf16 %v557_v56, %v1532_v52  ;;  %v1274_v58 = vpop.f32.mrb[3].mxu1 }
 0x1e6   : > { %1275 = vmatprep.subr.bf16.mxu0 %v715_v57 }
 0x1e7   : > { %1276 = vmatpush3.bf16.msra.mxu0 %v715_v57  ;;  %v561_v57 = vmul.f32 1.442695, %v1532_v52 }
 0x1e8   : > { %1285 = vmatprep.subr.bf16.mxu0 %v706_v59 }
 0x1ea   : > { %1278 = vmatmul.mubr.msk.bf16.vlgmr.msra.gmra.mrb[8].mxu0 %vm736_vm3, %v1365_v60 }
 0x1eb   : > { %1281 = vmatprep.mubr.msk.bf16.mxu0 %vm736_vm3, %v1366_v61  ;;  %1286 = vmatpush3.bf16.msra.mxu0 %v706_v59 }
 0x1f2   : > { %1282 = vmatmul.mubr.msk.bf16.gmra.mrb[12].mxu0 %vm736_vm3, %v1367_v62 }
 0x1f3   : > { %1287 = vmatprep.mubr.msk.bf16.mxu0 %vm736_vm3, %v1368_v63 }
 0x1fa   : > { %1288 = vmatmul.mubr.msk.bf16.vlgmr.msra.gmra.mrb[8].mxu0 %vm736_vm3, %v1369_v0 }
 0x1fb   : > { %1291 = vmatprep.mubr.msk.bf16.mxu0 %vm736_vm3, %v1370_v1 }
 0x202   : > { %1292 = vmatmul.mubr.msk.bf16.gmra.mrb[12].mxu0 %vm736_vm3, %v1371_v2 }
 0x2cd   : > { %v1289_v4 = vpop.f32.mrb[8].mxu0 }
 0x2ce   : > { %v880_v5 = vpop.f32.mrb[9].mxu0  ;;  %v913_v7 = vmax.f32 %v1289_v4, 0.0 }
 0x2cf   : > { %v1290_v6 = vpop.f32.mrb[10].mxu0  ;;  %v911_v11 = vmax.f32 %v880_v5, 0.0 }
 0x2d0   : > { %v914_v8 = vmax.f32 %v1290_v6, 0.0  ;;  %v883_v9 = vpop.f32.mrb[11].mxu0 }
 0x2d1   : > { %v912_v12 = vmax.f32 %v883_v9, 0.0 }
 0x2d2   : > { %v920_v13 = vpack.c.bf16 %v914_v8, %v913_v7 }
 0x2d3   : > { %v919_v14 = vpack.c.bf16 %v912_v12, %v911_v11 }
 0x2d5   : > { %v1293_v15 = vpop.f32.mrb[12].mxu0  ;;  %1295 = vmatprep.subr.bf16.mxu1 %v919_v14 }
 0x2d6   : > { %v896_v16 = vpop.f32.mrb[13].mxu0  ;;  %1296 = vmatpush3.bf16.msra.mxu1 %v919_v14  ;;  %v917_v18 = vmax.f32 %v1293_v15, 0.0 }
 0x2d7   : > { %v1294_v17 = vpop.f32.mrb[14].mxu0  ;;  %1297 = vmatprep.subr.bf16.mxu1 %v920_v13  ;;  %v915_v21 = vmax.f32 %v896_v16, 0.0 }
 0x2d8   : > { %v918_v19 = vmax.f32 %v1294_v17, 0.0  ;;  %v899_v20 = vpop.f32.mrb[15].mxu0 }
 0x2d9   : > { %v916_v22 = vmax.f32 %v899_v20, 0.0 }
 0x2da   : > { %v922_v23 = vpack.c.bf16 %v918_v19, %v917_v18  ;;  %1298 = vmatpush3.bf16.msra.mxu1 %v920_v13 }
 0x2db   : > { %v921_v24 = vpack.c.bf16 %v916_v22, %v915_v21 }
 0x2dd   : > { %1299 = vmatprep.subr.bf16.mxu1 %v921_v24 }
 0x2de   : > { %1300 = vmatpush3.bf16.msra.mxu1 %v921_v24 }
 0x2df   : > { %1301 = vmatprep.subr.bf16.mxu1 %v922_v23 }
 0x2e2   : > { %1302 = vmatpush3.bf16.msra.mxu1 %v922_v23 }
 0x2e3   : > { %1311 = vmatprep.subr.bf16.mxu1 %v1408_v10 }
 0x2e5   : > { %1304 = vmatmul.mubr.msk.bf16.vlgmr.msra.gmra.mrb[4].mxu1 %vm516_vm2, %v1373_v25 }
 0x2e6   : > { %1307 = vmatprep.mubr.msk.bf16.mxu1 %vm516_vm2, %v1374_v26 }
 0x2ed   : > { %1308 = vmatmul.mubr.msk.bf16.gmra.mrb[8].mxu1 %vm516_vm2, %v1375_v27 }
 0x2ee   : > { %1319 = vmatprep.mubr.msk.bf16.mxu1 %vm1409_vm1, %v1408_v10 }
 0x3b8   : > { %v1305_v28 = vpop.f32.mrb[4].mxu1 }
 0x3b9   : > { %v997_v29 = vpop.f32.mrb[5].mxu1  ;;  %v1030_v31 = vmax.f32 %v1305_v28, 0.0 }
 0x3ba   : > { %v1306_v30 = vpop.f32.mrb[6].mxu1  ;;  %v1028_v34 = vmax.f32 %v997_v29, 0.0 }
 0x3bb   : > { %v1031_v32 = vmax.f32 %v1306_v30, 0.0  ;;  %v1000_v33 = vpop.f32.mrb[7].mxu1 }
 0x3bc   : > { %v1029_v35 = vmax.f32 %v1000_v33, 0.0 }
 0x3bd   : > { %v1038_v36 = vpack.c.bf16 %v1031_v32, %v1030_v31 }
 0x3be   : > { %v1037_v37 = vpack.c.bf16 %v1029_v35, %v1028_v34 }
 0x3c0   : > { %v1309_v38 = vpop.f32.mrb[8].mxu1  ;;  %1312 = vmatpush3.bf16.msra.mxu1 %v1037_v37 }
 0x3c1   : > { %v1013_v39 = vpop.f32.mrb[9].mxu1  ;;  %1313 = vmatprep.subr.bf16.mxu1 %v1408_v10  ;;  %v1034_v41 = vmax.f32 %v1309_v38, 0.0 }
 0x3c2   : > { %v1310_v40 = vpop.f32.mrb[10].mxu1  ;;  %v1032_v45 = vmax.f32 %v1013_v39, 0.0 }
 0x3c3   : > { %v1035_v43 = vmax.f32 %v1310_v40, 0.0  ;;  %v1016_v44 = vpop.f32.mrb[11].mxu1 }
 0x3c4   : > { %v1033_v46 = vmax.f32 %v1016_v44, 0.0  ;;  %1314 = vmatpush3.bf16.msra.mxu1 %v1038_v36 }
 0x3c5   : > { %v1040_v47 = vpack.c.bf16 %v1035_v43, %v1034_v41  ;;  %1315 = vmatprep.subr.bf16.mxu1 %v1408_v10 }
 0x3c6   : > { %v1039_v42 = vpack.c.bf16 %v1033_v46, %v1032_v45 }
 0x3c8   : > { %1316 = vmatpush3.bf16.msra.mxu1 %v1039_v42 }
 0x3c9   : > { %1317 = vmatprep.subr.bf16.mxu1 %v1408_v10 }
 0x3cc   : > { %1318 = vmatpush3.bf16.msra.mxu1 %v1040_v47 }
 0x3cf   : > { %1320 = vmatmul.mubr.msk.bf16.vlgmr.msra.gmra.mrb[12].mxu1 %vm516_vm2, %v1036_v48 }
 0x4a2   : > { %v1078_v49 = vpop.f32.mrb[12].mxu1 }
 0x4a3   : > { %v1084_v50 = vsub.f32 0.0, %v1078_v49  ;;  %v1321_v51 = vpop.f32.mrb[13].mxu1 }
 0x4a4   : > { %v1081_v53 = vpop.f32.mrb[14].mxu1 }
 0x4a5   : > { %v1085_v54 = vmul.f32 1.442695, %v1084_v50  ;;  %v1322_v55 = vpop.f32.mrb[15].mxu1 }
 0x4a7   : > { %1378 = vpow2.f32 %v1085_v54 }
 0x4b1   : > { %v1379_v56 = vpop.eup %1378 }
 0x4b2   : > { %v1087_v58 = vadd.f32 1.0, %v1379_v56 }
 0x4b4   : > { %1380 = vrcp.f32 %v1087_v58 }
 0x4b5   : > { %1382 = vpow2.f32 %v561_v57 }
 0x4be   : > { %v1381_v10 = vpop.eup %1380 }
 0x4bf   : > { %v1091_v59 = vrot.slane %v1381_v10, 7  ;;  %v1383_v60 = vpop.eup %1382 }
 0x4c1   : > { %v1093_v61 = vsel %vm677_vm4, %v1383_v60, %v1091_v59 }
 0x4c2   : > { %1094 = vst [vmem:[%s373_s13] sm:$0xf] %v1093_v61 }
 0x4c3 PF: > { %p15_p9 = scmp.ge.s32.totalorder %s1472_s9, 4   ;;  %s1615_s27 = smov %s1402_s28 }
 0x4c4   : > { %s1616_s28 = smov %s1481_s12  ;;  %s1617_s29 = smov %s1472_s9 }
 0x4c5   :  { %17 = sbr.rel (!%p15_p9) target bundleno = 2 (0x2), region = 131 }

</bundles_post_ra>
